<compile_context>
chip_gen: v7x
topology: tpu7x:2x2x1
jax: 0.10.0
libtpu: 0.0.40
codegen_flags: <defaults>
</compile_context>

<pallas_src>
import jax
import jax.numpy as jnp
from jax import lax
from jax.experimental import pallas as pl
from jax.experimental.pallas import tpu as pltpu

# ----------------------------- "config" ------------------------------------
HIDDEN = 32          # config.hidden_size
NUM_HEADS = 4        # config.num_attention_heads
HEAD_DIM = HIDDEN // NUM_HEADS
LORA_R = 4           # config.lora_r
LORA_ALPHA = 8       # config.lora_alpha
LORA_SCALING = LORA_ALPHA / LORA_R
SCALING = HEAD_DIM ** (-0.5)
ATTN_DROPOUT = 0.0   # eval mode -> identity
NEG_MIN = float(jnp.finfo(jnp.float32).min)   # clamp value (matches torch.finfo.min)
NEG_SENT = -1e30     # finite cross-batch sentinel: exp(NEG_SENT - rowmax) == 0 exactly

B = 2                # batch
T = 8                # tgt_len (query time)
S = 8                # src_len (neighbor / key-value time)


# ------------------------------ kernel --------------------------------------
def lora_attention_kernel(h_ref, kv_ref, mask_ref, w_ref, b_ref, out_ref):
    # Single grid step; batch is folded into rows (sublanes).
    D = HIDDEN
    h = h_ref[...]          # (B*T, D)
    kv = kv_ref[...]        # (B*S, D)
    mask = mask_ref[...]    # (B*T, B*S) block-diagonal additive mask

    # Packed weights: sublane-row slices (static, 8-aligned -> free views).
    wq = w_ref[0 * D:1 * D, :]     # (D, D)  = Wq^T
    wk = w_ref[1 * D:2 * D, :]     # (D, D)  = Wk^T
    wv = w_ref[2 * D:3 * D, :]     # (D, D)  = (lora_A^T @ lora_B^T) * lora_scaling
    wo = w_ref[3 * D:4 * D, :]     # (D, D)  = Wo^T
    bq = b_ref[0:1, :]
    bk = b_ref[1:2, :]
    bo = b_ref[2:3, :]

    # Projections (weights pre-transposed to (in, out): y = x @ W + b, no .T).
    q = (jnp.dot(h, wq, preferred_element_type=jnp.float32) + bq) * SCALING   # (BT, D)
    k = jnp.dot(kv, wk, preferred_element_type=jnp.float32) + bk              # (BS, D)
    v = jnp.dot(kv, wv, preferred_element_type=jnp.float32)                   # (BS, D) LoRA folded

    ctx_heads = []
    for hh in range(NUM_HEADS):
        sl = slice(hh * HEAD_DIM, (hh + 1) * HEAD_DIM)
        qh = q[:, sl]                                                          # (BT, hd)
        kh = k[:, sl]                                                          # (BS, hd)
        vh = v[:, sl]                                                          # (BS, hd)

        # scores = qh @ kh^T via dot_general (no materialized transpose).
        scores = lax.dot_general(qh, kh, (((1,), (1,)), ((), ())),
                                 preferred_element_type=jnp.float32)          # (BT, BS)
        scores = jnp.maximum(scores + mask, NEG_MIN)
        scores = scores - jnp.max(scores, axis=-1, keepdims=True)
        p = jnp.exp(scores)
        denom = jnp.sum(p, axis=-1, keepdims=True)                             # (BT, 1)

        # Deferred normalization: EUP approx reciprocal instead of a (BT,BS) divide.
        ctx = jnp.dot(p, vh, preferred_element_type=jnp.float32)               # (BT, hd)
        ctx_heads.append(ctx * pl.reciprocal(denom, approx=True))
        # (attention dropout is identity in eval mode)

    # Single output projection: lane-concat the head contexts, one (BT,D)@(D,D) dot.
    ctx_full = jnp.concatenate(ctx_heads, axis=-1)                             # (BT, D)
    out_ref[...] = jnp.dot(ctx_full, wo, preferred_element_type=jnp.float32) + bo


# --------------------------- parameter packing -------------------------------
def pack_lora_attention_params(params):
    """One-time prep: transpose to (in,out), fold LoRA pair, stack weights/biases."""
    wv_eff = (params["wa"].T @ params["wb"].T) * LORA_SCALING        # (D, D)
    w_pack = jnp.concatenate(
        [params["wq"].T, params["wk"].T, wv_eff, params["wo"].T], axis=0)  # (4D, D)
    b_pack = jnp.zeros((8, HIDDEN), jnp.float32)                     # pad to 8 sublanes
    b_pack = b_pack.at[0].set(params["bq"].reshape(-1))
    b_pack = b_pack.at[1].set(params["bk"].reshape(-1))
    b_pack = b_pack.at[2].set(params["bo"].reshape(-1))
    return {"w_pack": w_pack, "b_pack": b_pack}


# ------------------------------ wrapper --------------------------------------
@jax.jit
def lora_attention(hidden_states, neighbor_embeds, attention_mask, packed):
    Bz, Tq, D = hidden_states.shape
    Sk = neighbor_embeds.shape[1]
    BT, BS = Bz * Tq, Bz * Sk

    # Fold batch into the sublane axis -> one kernel invocation, no per-batch grid.
    h2 = hidden_states.reshape(BT, D)
    kv2 = neighbor_embeds.reshape(BS, D)

    # Block-diagonal additive mask: per-batch mask on diagonal blocks, finite -1e30
    # off-diagonal so cross-batch softmax contributions are exactly 0 (no -inf).
    m = attention_mask[:, 0].astype(jnp.float32)                 # (B, T, S)
    eye = jnp.eye(Bz, dtype=bool)[:, None, :, None]              # (B, 1, B, 1)
    mask2 = jnp.where(eye, m[:, :, None, :], NEG_SENT).reshape(BT, BS)

    full = lambda shape: pl.BlockSpec(shape, lambda i: (0,) * len(shape))

    out2 = pl.pallas_call(
        lora_attention_kernel,
        out_shape=jax.ShapeDtypeStruct((BT, D), jnp.float32),
        grid_spec=pltpu.PrefetchScalarGridSpec(
            num_scalar_prefetch=0,
            grid=(1,),
            in_specs=[
                full((BT, D)),        # hidden (flattened batch)
                full((BS, D)),        # neighbor kv (flattened batch)
                full((BT, BS)),       # block-diagonal mask
                full((4 * D, D)),     # packed weights [Wq^T; Wk^T; Wv_eff; Wo^T]
                full((8, D)),         # packed biases  [bq; bk; bo; 0...]
            ],
            out_specs=full((BT, D)),
        ),
        compiler_params=pltpu.CompilerParams(
            dimension_semantics=("arbitrary",)),
    )(h2, kv2, mask2, packed["w_pack"], packed["b_pack"])

    return out2.reshape(Bz, Tq, D)


# --------------------------- pure-JAX reference -------------------------------
def lora_attention_ref(h, kv, mask, params):
    q = (h @ params["wq"].T + params["bq"]) * SCALING
    k = kv @ params["wk"].T + params["bk"]
    v = (kv @ params["wa"].T) @ params["wb"].T * LORA_SCALING   # unfolded two-dot path
    Bz, Tq, D = h.shape

    def shape_heads(x):
        return x.reshape(Bz, -1, NUM_HEADS, HEAD_DIM).transpose(0, 2, 1, 3)

    qh, kh, vh = shape_heads(q), shape_heads(k), shape_heads(v)
    scores = jnp.einsum("bhtd,bhsd->bhts", qh, kh)
    scores = jnp.maximum(scores + mask, NEG_MIN)      # mask (B,1,T,S) broadcasts
    probs = jax.nn.softmax(scores, axis=-1)
    ctx = jnp.einsum("bhts,bhsd->bhtd", probs, vh)
    ctx = ctx.transpose(0, 2, 1, 3).reshape(Bz, Tq, D)
    return ctx @ params["wo"].T + params["bo"]


# ------------------------------- main -----------------------------------------
if __name__ == "__main__":
    key = jax.random.PRNGKey(0)
    keys = jax.random.split(key, 12)

    def init(k, shape, scale=0.05):
        return (scale * jax.random.normal(k, shape)).astype(jnp.float32)

    params = {
        "wq": init(keys[0], (HIDDEN, HIDDEN)),
        "bq": init(keys[1], (1, HIDDEN)),
        "wk": init(keys[2], (HIDDEN, HIDDEN)),
        "bk": init(keys[3], (1, HIDDEN)),
        "wa": init(keys[4], (LORA_R, HIDDEN)),
        "wb": init(keys[5], (HIDDEN, LORA_R)),
        "wo": init(keys[6], (HIDDEN, HIDDEN)),
        "bo": init(keys[7], (1, HIDDEN)),
    }

    hidden_states = jax.random.normal(keys[8], (B, T, HIDDEN), dtype=jnp.float32)
    neighbor_embeds = jax.random.normal(keys[9], (B, S, HIDDEN), dtype=jnp.float32)

    # additive attention mask: batch 1 has its last 2 neighbor positions masked
    mask = jnp.zeros((B, 1, T, S), dtype=jnp.float32)
    mask = mask.at[1, :, :, -2:].set(-1e9)

    packed = pack_lora_attention_params(params)     # one-time parameter prep

    out = lora_attention(hidden_states, neighbor_embeds, mask, packed)
    out = jax.block_until_ready(out)

    ref = lora_attention_ref(hidden_states, neighbor_embeds, mask, params)
    assert out.shape == (B, T, HIDDEN)
    assert jnp.allclose(out, ref, rtol=1e-4, atol=1e-4), (
        f"max abs err = {jnp.max(jnp.abs(out - ref))}")

    print("KERNEL_OK")
</pallas_src>

<mosaic_0001>
module attributes {stable_mosaic.version = 11 : i64} {
  func.func @lora_attention_kernel(%arg0: i32, %arg1: memref<16x32xf32, #tpu.memory_space<vmem>>, %arg2: memref<16x32xf32, #tpu.memory_space<vmem>>, %arg3: memref<16x16xf32, #tpu.memory_space<vmem>>, %arg4: memref<128x32xf32, #tpu.memory_space<vmem>>, %arg5: memref<8x32xf32, #tpu.memory_space<vmem>>, %arg6: memref<16x32xf32, #tpu.memory_space<vmem>>) attributes {dimension_semantics = [#tpu.dimension_semantics<arbitrary>], iteration_bounds = array<i64: 1>, scalar_prefetch = 0 : i64, scratch_operands = 0 : i64, tpu.core_type = #tpu.core_type<tc>, window_params = [{pipeline_mode = #tpu.pipeline_mode<synchronous>, transform_indices = @transform_0, window_bounds = array<i64: 16, 32>}, {pipeline_mode = #tpu.pipeline_mode<synchronous>, transform_indices = @transform_1, window_bounds = array<i64: 16, 32>}, {pipeline_mode = #tpu.pipeline_mode<synchronous>, transform_indices = @transform_2, window_bounds = array<i64: 16, 16>}, {pipeline_mode = #tpu.pipeline_mode<synchronous>, transform_indices = @transform_3, window_bounds = array<i64: 128, 32>}, {pipeline_mode = #tpu.pipeline_mode<synchronous>, transform_indices = @transform_4, window_bounds = array<i64: 8, 32>}, {pipeline_mode = #tpu.pipeline_mode<synchronous>, transform_indices = @transform_5, window_bounds = array<i64: 16, 32>}]} {
    %c0 = arith.constant 0 : index
    %c0_0 = arith.constant 0 : index
    %0 = vector.load %arg1[%c0, %c0_0] : memref<16x32xf32, #tpu.memory_space<vmem>>, vector<16x32xf32>
    %c0_1 = arith.constant 0 : index
    %c0_2 = arith.constant 0 : index
    %1 = vector.load %arg2[%c0_1, %c0_2] : memref<16x32xf32, #tpu.memory_space<vmem>>, vector<16x32xf32>
    %c0_3 = arith.constant 0 : index
    %c0_4 = arith.constant 0 : index
    %2 = vector.load %arg3[%c0_3, %c0_4] : memref<16x16xf32, #tpu.memory_space<vmem>>, vector<16x16xf32>
    %c0_5 = arith.constant 0 : index
    %c0_6 = arith.constant 0 : index
    %3 = vector.load %arg4[%c0_5, %c0_6] : memref<128x32xf32, #tpu.memory_space<vmem>>, vector<32x32xf32>
    %c32 = arith.constant 32 : index
    %c0_7 = arith.constant 0 : index
    %4 = vector.load %arg4[%c32, %c0_7] : memref<128x32xf32, #tpu.memory_space<vmem>>, vector<32x32xf32>
    %c64 = arith.constant 64 : index
    %c0_8 = arith.constant 0 : index
    %5 = vector.load %arg4[%c64, %c0_8] : memref<128x32xf32, #tpu.memory_space<vmem>>, vector<32x32xf32>
    %c96 = arith.constant 96 : index
    %c0_9 = arith.constant 0 : index
    %6 = vector.load %arg4[%c96, %c0_9] : memref<128x32xf32, #tpu.memory_space<vmem>>, vector<32x32xf32>
    %c0_10 = arith.constant 0 : index
    %c0_11 = arith.constant 0 : index
    %7 = vector.load %arg5[%c0_10, %c0_11] : memref<8x32xf32, #tpu.memory_space<vmem>>, vector<1x32xf32>
    %c1 = arith.constant 1 : index
    %c0_12 = arith.constant 0 : index
    %8 = vector.load %arg5[%c1, %c0_12] : memref<8x32xf32, #tpu.memory_space<vmem>>, vector<1x32xf32>
    %c2 = arith.constant 2 : index
    %c0_13 = arith.constant 0 : index
    %9 = vector.load %arg5[%c2, %c0_13] : memref<8x32xf32, #tpu.memory_space<vmem>>, vector<1x32xf32>
    %cst = arith.constant dense<0.000000e+00> : vector<16x32xf32>
    %10 = tpu.matmul %0, %3, %cst {dimension_numbers = #tpu.dot_dimension_numbers<[1], [0], [0], [1], [0, 0, 1, 1], [], []>} : vector<16x32xf32>, vector<32x32xf32>, vector<16x32xf32> -> vector<16x32xf32>
    %11 = vector.broadcast %7 : vector<1x32xf32> to vector<16x32xf32>
    %12 = arith.addf %10, %11 : vector<16x32xf32>
    %cst_14 = arith.constant 0.353553385 : f32
    %13 = vector.broadcast %cst_14 : f32 to vector<16x32xf32>
    %14 = arith.mulf %12, %13 : vector<16x32xf32>
    %cst_15 = arith.constant dense<0.000000e+00> : vector<16x32xf32>
    %15 = tpu.matmul %1, %4, %cst_15 {dimension_numbers = #tpu.dot_dimension_numbers<[1], [0], [0], [1], [0, 0, 1, 1], [], []>} : vector<16x32xf32>, vector<32x32xf32>, vector<16x32xf32> -> vector<16x32xf32>
    %16 = vector.broadcast %8 : vector<1x32xf32> to vector<16x32xf32>
    %17 = arith.addf %15, %16 : vector<16x32xf32>
    %cst_16 = arith.constant dense<0.000000e+00> : vector<16x32xf32>
    %18 = tpu.matmul %1, %5, %cst_16 {dimension_numbers = #tpu.dot_dimension_numbers<[1], [0], [0], [1], [0, 0, 1, 1], [], []>} : vector<16x32xf32>, vector<32x32xf32>, vector<16x32xf32> -> vector<16x32xf32>
    %19 = vector.extract_strided_slice %14 {offsets = [0, 0], sizes = [16, 8], strides = [1, 1]} : vector<16x32xf32> to vector<16x8xf32>
    %20 = vector.extract_strided_slice %17 {offsets = [0, 0], sizes = [16, 8], strides = [1, 1]} : vector<16x32xf32> to vector<16x8xf32>
    %21 = vector.extract_strided_slice %18 {offsets = [0, 0], sizes = [16, 8], strides = [1, 1]} : vector<16x32xf32> to vector<16x8xf32>
    %cst_17 = arith.constant dense<0.000000e+00> : vector<16x16xf32>
    %22 = tpu.matmul %19, %20, %cst_17 {dimension_numbers = #tpu.dot_dimension_numbers<[1], [1], [0], [0], [0, 0, 1, 0], [], []>} : vector<16x8xf32>, vector<16x8xf32>, vector<16x16xf32> -> vector<16x16xf32>
    %23 = arith.addf %22, %2 : vector<16x16xf32>
    %cst_18 = arith.constant -3.40282347E+38 : f32
    %24 = vector.broadcast %cst_18 : f32 to vector<16x16xf32>
    %25 = arith.maximumf %23, %24 : vector<16x16xf32>
    %cst_19 = arith.constant dense<0xFF800000> : vector<16xf32>
    %26 = vector.multi_reduction <maximumf>, %25, %cst_19 [1] : vector<16x16xf32> to vector<16xf32>
    %27 = vector.shape_cast %26 : vector<16xf32> to vector<16x1xf32>
    %28 = vector.broadcast %27 : vector<16x1xf32> to vector<16x16xf32>
    %29 = arith.subf %25, %28 : vector<16x16xf32>
    %30 = math.exp %29 : vector<16x16xf32>
    %cst_20 = arith.constant dense<0.000000e+00> : vector<16xf32>
    %31 = vector.multi_reduction <add>, %30, %cst_20 [1] : vector<16x16xf32> to vector<16xf32>
    %32 = vector.shape_cast %31 : vector<16xf32> to vector<16x1xf32>
    %cst_21 = arith.constant dense<0.000000e+00> : vector<16x8xf32>
    %33 = tpu.matmul %30, %21, %cst_21 {dimension_numbers = #tpu.dot_dimension_numbers<[1], [0], [0], [1], [0, 0, 1, 1], [], []>} : vector<16x16xf32>, vector<16x8xf32>, vector<16x8xf32> -> vector<16x8xf32>
    %34 = tpu.reciprocal %32 {approx = true} : vector<16x1xf32> -> vector<16x1xf32>
    %35 = vector.broadcast %34 : vector<16x1xf32> to vector<16x8xf32>
    %36 = arith.mulf %33, %35 : vector<16x8xf32>
    %37 = vector.extract_strided_slice %14 {offsets = [0, 8], sizes = [16, 8], strides = [1, 1]} : vector<16x32xf32> to vector<16x8xf32>
    %38 = vector.extract_strided_slice %17 {offsets = [0, 8], sizes = [16, 8], strides = [1, 1]} : vector<16x32xf32> to vector<16x8xf32>
    %39 = vector.extract_strided_slice %18 {offsets = [0, 8], sizes = [16, 8], strides = [1, 1]} : vector<16x32xf32> to vector<16x8xf32>
    %cst_22 = arith.constant dense<0.000000e+00> : vector<16x16xf32>
    %40 = tpu.matmul %37, %38, %cst_22 {dimension_numbers = #tpu.dot_dimension_numbers<[1], [1], [0], [0], [0, 0, 1, 0], [], []>} : vector<16x8xf32>, vector<16x8xf32>, vector<16x16xf32> -> vector<16x16xf32>
    %41 = arith.addf %40, %2 : vector<16x16xf32>
    %cst_23 = arith.constant -3.40282347E+38 : f32
    %42 = vector.broadcast %cst_23 : f32 to vector<16x16xf32>
    %43 = arith.maximumf %41, %42 : vector<16x16xf32>
    %cst_24 = arith.constant dense<0xFF800000> : vector<16xf32>
    %44 = vector.multi_reduction <maximumf>, %43, %cst_24 [1] : vector<16x16xf32> to vector<16xf32>
    %45 = vector.shape_cast %44 : vector<16xf32> to vector<16x1xf32>
    %46 = vector.broadcast %45 : vector<16x1xf32> to vector<16x16xf32>
    %47 = arith.subf %43, %46 : vector<16x16xf32>
    %48 = math.exp %47 : vector<16x16xf32>
    %cst_25 = arith.constant dense<0.000000e+00> : vector<16xf32>
    %49 = vector.multi_reduction <add>, %48, %cst_25 [1] : vector<16x16xf32> to vector<16xf32>
    %50 = vector.shape_cast %49 : vector<16xf32> to vector<16x1xf32>
    %cst_26 = arith.constant dense<0.000000e+00> : vector<16x8xf32>
    %51 = tpu.matmul %48, %39, %cst_26 {dimension_numbers = #tpu.dot_dimension_numbers<[1], [0], [0], [1], [0, 0, 1, 1], [], []>} : vector<16x16xf32>, vector<16x8xf32>, vector<16x8xf32> -> vector<16x8xf32>
    %52 = tpu.reciprocal %50 {approx = true} : vector<16x1xf32> -> vector<16x1xf32>
    %53 = vector.broadcast %52 : vector<16x1xf32> to vector<16x8xf32>
    %54 = arith.mulf %51, %53 : vector<16x8xf32>
    %55 = vector.extract_strided_slice %14 {offsets = [0, 16], sizes = [16, 8], strides = [1, 1]} : vector<16x32xf32> to vector<16x8xf32>
    %56 = vector.extract_strided_slice %17 {offsets = [0, 16], sizes = [16, 8], strides = [1, 1]} : vector<16x32xf32> to vector<16x8xf32>
    %57 = vector.extract_strided_slice %18 {offsets = [0, 16], sizes = [16, 8], strides = [1, 1]} : vector<16x32xf32> to vector<16x8xf32>
    %cst_27 = arith.constant dense<0.000000e+00> : vector<16x16xf32>
    %58 = tpu.matmul %55, %56, %cst_27 {dimension_numbers = #tpu.dot_dimension_numbers<[1], [1], [0], [0], [0, 0, 1, 0], [], []>} : vector<16x8xf32>, vector<16x8xf32>, vector<16x16xf32> -> vector<16x16xf32>
    %59 = arith.addf %58, %2 : vector<16x16xf32>
    %cst_28 = arith.constant -3.40282347E+38 : f32
    %60 = vector.broadcast %cst_28 : f32 to vector<16x16xf32>
    %61 = arith.maximumf %59, %60 : vector<16x16xf32>
    %cst_29 = arith.constant dense<0xFF800000> : vector<16xf32>
    %62 = vector.multi_reduction <maximumf>, %61, %cst_29 [1] : vector<16x16xf32> to vector<16xf32>
    %63 = vector.shape_cast %62 : vector<16xf32> to vector<16x1xf32>
    %64 = vector.broadcast %63 : vector<16x1xf32> to vector<16x16xf32>
    %65 = arith.subf %61, %64 : vector<16x16xf32>
    %66 = math.exp %65 : vector<16x16xf32>
    %cst_30 = arith.constant dense<0.000000e+00> : vector<16xf32>
    %67 = vector.multi_reduction <add>, %66, %cst_30 [1] : vector<16x16xf32> to vector<16xf32>
    %68 = vector.shape_cast %67 : vector<16xf32> to vector<16x1xf32>
    %cst_31 = arith.constant dense<0.000000e+00> : vector<16x8xf32>
    %69 = tpu.matmul %66, %57, %cst_31 {dimension_numbers = #tpu.dot_dimension_numbers<[1], [0], [0], [1], [0, 0, 1, 1], [], []>} : vector<16x16xf32>, vector<16x8xf32>, vector<16x8xf32> -> vector<16x8xf32>
    %70 = tpu.reciprocal %68 {approx = true} : vector<16x1xf32> -> vector<16x1xf32>
    %71 = vector.broadcast %70 : vector<16x1xf32> to vector<16x8xf32>
    %72 = arith.mulf %69, %71 : vector<16x8xf32>
    %73 = vector.extract_strided_slice %14 {offsets = [0, 24], sizes = [16, 8], strides = [1, 1]} : vector<16x32xf32> to vector<16x8xf32>
    %74 = vector.extract_strided_slice %17 {offsets = [0, 24], sizes = [16, 8], strides = [1, 1]} : vector<16x32xf32> to vector<16x8xf32>
    %75 = vector.extract_strided_slice %18 {offsets = [0, 24], sizes = [16, 8], strides = [1, 1]} : vector<16x32xf32> to vector<16x8xf32>
    %cst_32 = arith.constant dense<0.000000e+00> : vector<16x16xf32>
    %76 = tpu.matmul %73, %74, %cst_32 {dimension_numbers = #tpu.dot_dimension_numbers<[1], [1], [0], [0], [0, 0, 1, 0], [], []>} : vector<16x8xf32>, vector<16x8xf32>, vector<16x16xf32> -> vector<16x16xf32>
    %77 = arith.addf %76, %2 : vector<16x16xf32>
    %cst_33 = arith.constant -3.40282347E+38 : f32
    %78 = vector.broadcast %cst_33 : f32 to vector<16x16xf32>
    %79 = arith.maximumf %77, %78 : vector<16x16xf32>
    %cst_34 = arith.constant dense<0xFF800000> : vector<16xf32>
    %80 = vector.multi_reduction <maximumf>, %79, %cst_34 [1] : vector<16x16xf32> to vector<16xf32>
    %81 = vector.shape_cast %80 : vector<16xf32> to vector<16x1xf32>
    %82 = vector.broadcast %81 : vector<16x1xf32> to vector<16x16xf32>
    %83 = arith.subf %79, %82 : vector<16x16xf32>
    %84 = math.exp %83 : vector<16x16xf32>
    %cst_35 = arith.constant dense<0.000000e+00> : vector<16xf32>
    %85 = vector.multi_reduction <add>, %84, %cst_35 [1] : vector<16x16xf32> to vector<16xf32>
    %86 = vector.shape_cast %85 : vector<16xf32> to vector<16x1xf32>
    %cst_36 = arith.constant dense<0.000000e+00> : vector<16x8xf32>
    %87 = tpu.matmul %84, %75, %cst_36 {dimension_numbers = #tpu.dot_dimension_numbers<[1], [0], [0], [1], [0, 0, 1, 1], [], []>} : vector<16x16xf32>, vector<16x8xf32>, vector<16x8xf32> -> vector<16x8xf32>
    %88 = tpu.reciprocal %86 {approx = true} : vector<16x1xf32> -> vector<16x1xf32>
    %89 = vector.broadcast %88 : vector<16x1xf32> to vector<16x8xf32>
    %90 = arith.mulf %87, %89 : vector<16x8xf32>
    %91 = tpu.concatenate %36, %54, %72, %90 in 1 : vector<16x8xf32>, vector<16x8xf32>, vector<16x8xf32>, vector<16x8xf32> -> vector<16x32xf32>
    %cst_37 = arith.constant dense<0.000000e+00> : vector<16x32xf32>
    %92 = tpu.matmul %91, %6, %cst_37 {dimension_numbers = #tpu.dot_dimension_numbers<[1], [0], [0], [1], [0, 0, 1, 1], [], []>} : vector<16x32xf32>, vector<32x32xf32>, vector<16x32xf32> -> vector<16x32xf32>
    %93 = vector.broadcast %9 : vector<1x32xf32> to vector<16x32xf32>
    %94 = arith.addf %92, %93 : vector<16x32xf32>
    %c0_38 = arith.constant 0 : index
    %c0_39 = arith.constant 0 : index
    %95 = vector.load %arg6[%c0_38, %c0_39] : memref<16x32xf32, #tpu.memory_space<vmem>>, vector<16x32xf32>
    tpu.vector_store %arg6[%c0_38, %c0_39], %94 {strides = array<i32>} : memref<16x32xf32, #tpu.memory_space<vmem>>, vector<16x32xf32>,
    return
  }
  func.func @transform_0(%arg0: i32) -> (i32, i32) {
    %c0_i32 = arith.constant 0 : i32
    %c0_i32_0 = arith.constant 0 : i32
    %c0_i32_1 = arith.constant 0 : i32
    return %c0_i32, %c0_i32_0 : i32, i32
  }
  func.func @transform_1(%arg0: i32) -> (i32, i32) {
    %c0_i32 = arith.constant 0 : i32
    %c0_i32_0 = arith.constant 0 : i32
    %c0_i32_1 = arith.constant 0 : i32
    return %c0_i32, %c0_i32_0 : i32, i32
  }
  func.func @transform_2(%arg0: i32) -> (i32, i32) {
    %c0_i32 = arith.constant 0 : i32
    %c0_i32_0 = arith.constant 0 : i32
    %c0_i32_1 = arith.constant 0 : i32
    return %c0_i32, %c0_i32_0 : i32, i32
  }
  func.func @transform_3(%arg0: i32) -> (i32, i32) {
    %c0_i32 = arith.constant 0 : i32
    %c0_i32_0 = arith.constant 0 : i32
    %c0_i32_1 = arith.constant 0 : i32
    return %c0_i32, %c0_i32_0 : i32, i32
  }
  func.func @transform_4(%arg0: i32) -> (i32, i32) {
    %c0_i32 = arith.constant 0 : i32
    %c0_i32_0 = arith.constant 0 : i32
    %c0_i32_1 = arith.constant 0 : i32
    return %c0_i32, %c0_i32_0 : i32, i32
  }
  func.func @transform_5(%arg0: i32) -> (i32, i32) {
    %c0_i32 = arith.constant 0 : i32
    %c0_i32_0 = arith.constant 0 : i32
    %c0_i32_1 = arith.constant 0 : i32
    return %c0_i32, %c0_i32_0 : i32, i32
  }
}

</mosaic_0001>

<bundles_post_ra>
// kernel: lora_attention.1
= control target key start
LH: loop header
LB: loop body
LE: loop exit
PB: predicated region body
PF: predicated region fallthrough
CT: control target
= control target key end

     0   :  { %vm50_vm0 = vcmask 261120   ;;  %s1848_s0 = inlined_call_operand.vmem [shape: f32[16,32], index: 0, kind: input, shape index: {}]   ;;  %s1849_s1 = inlined_call_operand.vmem [shape: f32[16,32], index: 1, kind: input, shape index: {}]   ;;  %s1850_s2 = inlined_call_operand.vmem [shape: f32[16,16], index: 2, kind: input, shape index: {}]   ;;  %s1851_s3 = inlined_call_operand.vmem [shape: f32[128,32], index: 3, kind: input, shape index: {}]   ;;  %s1852_s4 = inlined_call_operand.vmem [shape: f32[8,32], index: 4, kind: input, shape index: {}]   ;;  %s1853_s5 = inlined_call_operand.hbm [shape: f32[16,32], index: 5, kind: output, shape index: {}]  }
   0x1   :  { %v31_v0 = vld [vmem:[%s1851_s3 + $0x20] sm:$0xff]  ;;  %v32_v1 = vld [vmem:[%s1851_s3 + $0x28] sm:$0xff]  ;;  %v33_v2 = vld [vmem:[%s1851_s3 + $0x30] sm:$0xff] }
   0x2   :  { %v1429_v3 = vpack.c.bf16 %v32_v1, %v31_v0  ;;  %v34_v4 = vld [vmem:[%s1851_s3 + $0x38] sm:$0xff]  ;;  %v27_v5 = vld [vmem:[%s1851_s3] sm:$0xff]  ;;  %v28_v6 = vld [vmem:[%s1851_s3 + $0x8] sm:$0xff] }
   0x3   :  { %v1433_v7 = vpack.c.bf16 %v34_v4, %v33_v2  ;;  %v1421_v8 = vpack.c.bf16 %v28_v6, %v27_v5  ;;  %v23_v9 = vld [vmem:[%s1849_s1] sm:$0xff]  ;;  %v29_v10 = vld [vmem:[%s1851_s3 + $0x10] sm:$0xff]  ;;  %v30_v11 = vld [vmem:[%s1851_s3 + $0x18] sm:$0xff] }
   0x4   :  { %1430 = vmatprep.subr.bf16.mxu1 %v1429_v3  ;;  %1340 = vmatprep.mubr.msk.f32.mxu1 %vm50_vm0, %v23_v9  ;;  %v21_v12 = vld [vmem:[%s1848_s0] sm:$0xff]  ;;  %v1425_v13 = vpack.c.bf16 %v30_v11, %v29_v10  ;;  %v36_v15 = vld [vmem:[%s1851_s3 + $0x48] sm:$0xff] }
   0x5   :  { %1432 = vmatpush3.bf16.msra.mxu1 %v1429_v3  ;;  %1422 = vmatprep.subr.bf16.mxu0 %v1421_v8  ;;  %v35_v14 = vld [vmem:[%s1851_s3 + $0x40] sm:$0xff] }
   0x6   :  { %1434 = vmatprep.subr.bf16.mxu1 %v1433_v7  ;;  %1424 = vmatpush3.bf16.msra.mxu0 %v1421_v8 }
   0x7   :  { %10 = vsyncpa [#allocation3], 0  ;;  %1426 = vmatprep.subr.bf16.mxu0 %v1425_v13  ;;  %1329 = vmatprep.mubr.msk.f32.mxu0 %vm50_vm0, %v21_v12  ;;  %v1437_v16 = vpack.c.bf16 %v36_v15, %v35_v14  ;;  %v37_v17 = vld [vmem:[%s1851_s3 + $0x50] sm:$0xff]  ;;  %v38_v18 = vld [vmem:[%s1851_s3 + $0x58] sm:$0xff]  ;;  %vm294_vm1 = vcmask 64512   ;;  %s1587_s27 = smov 120  }
   0x8   :  { %v24_v19 = vld [vmem:[%s1849_s1 + $0x8] sm:$0xff]  ;;  %v1441_v21 = vpack.c.bf16 %v38_v18, %v37_v17  ;;  %v1233_v22 = vld [vmem:[%s1852_s4 + $0x1] ss:$0 sm:$0xff]  ;;  %v1230_v24 = vld [vmem:[%s1852_s4] ss:$0 sm:$0xff]  ;;  %vm384_vm3 = vcmask 130048  }
   0x9   :  { %1436 = vmatpush3.bf16.msra.mxu1 %v1433_v7  ;;  %v22_v20 = vld [vmem:[%s1848_s0 + $0x8] sm:$0xff]  ;;  %vm1687_vm2 = vmpackc.low %vm294_vm1, %vm294_vm1  ;;  %v1719_v45 = vld [vmem:[%s1850_s2] sm:$0xff]  ;;  %s1589_s7 = smov 104   ;;  %s1590_s8 = smov 16   ;;  %vm1124_vm4 = vcmask 195584  }
   0xa   :  { %1428 = vmatpush3.bf16.msra.mxu0 %v1425_v13  ;;  %v1714_v44 = vld [vmem:[%s1850_s2 + $0x8] sm:$0xff]  ;;  %s1588_s2 = smov 112   ;;  %s1591_s9 = smov 8  }
   0xb   :  { %1438 = vmatprep.subr.bf16.mxu0 %v1437_v16  ;;  %s1592_s18 = smov 24   ;;  %s1593_s20 = smov [#allocation2]  }
   0xc   :  { %1341 = vmatmul.mubr.msk.f32.vlgmr.msra.gmra.mrb[0].mxu1 %vm50_vm0, %v24_v19  ;;  %s1219_s21 = sshll.u32 %s1593_s20, 4  ;;  %s1220_s21 = int_to_ptr.vmem [resolvable:$true] %s1219_s21 }
   0xd   :  { %1330 = vmatmul.mubr.msk.f32.vlgmr.msra.gmra.mrb[0].mxu0 %vm50_vm0, %v22_v20  ;;  %s1563_s22 = scalar_lea.vmem %s1220_s21, 256  ;;  %p1568_p1 = scmp.lt.s32.totalorder %s1220_s21, %s1220_s21 }
   0xe   :  { %1440 = vmatpush3.bf16.msra.mxu0 %v1437_v16  ;;  %1351 = vmatprep.mubr.msk.f32.mxu0 %vm50_vm0, %v23_v9  ;;  %p1564_p0 = scmp.ne.s32.totalorder %s1220_s21, %s1563_s22  ;;  %p1569_p2 = scmp.lt.s32.totalorder %s1563_s22, %s1563_s22 }
   0xf   :  { %1442 = vmatprep.subr.bf16.mxu0 %v1441_v21 }
  0x10   :  { %p1570_p3 = por %p1569_p2, %p1568_p1 }
  0x12   :  { %1444 = vmatpush3.bf16.msra.mxu0 %v1441_v21  ;;  %p1571_p4 = pnand %p1570_p3, %p1564_p0 }
  0x15   :  { %1352 = vmatmul.mubr.msk.f32.vlgmr.msra.gmra.mrb[2].mxu0 %vm50_vm0, %v24_v19 }
  0xdf   :  { %v1342_v23 = vpop.f32.mrb[0].mxu1 }
  0xe0   :  { %v216_v25 = vadd.f32 %v1342_v23, %v1233_v22  ;;  %v210_v26 = vpop.f32.mrb[1].mxu1  ;;  %v1331_v27 = vpop.f32.mrb[0].mxu0 }
  0xe1   :  { %v211_v28 = vadd.f32 %v1233_v22, %v210_v26  ;;  %v123_v29 = vpop.f32.mrb[1].mxu0  ;;  %v129_v35 = vadd.f32 %v1331_v27, %v1230_v24 }
  0xe2   :  { %v124_v31 = vadd.f32 %v1230_v24, %v123_v29 }
  0xe3   :  { %v1691_v32 = vpack.i.bf16 %v216_v25, %v211_v28  ;;  %v1445_v33 = vpack.c.bf16 %v216_v25, %v211_v28  ;;  %v1705_v39 = vmul.f32 0.35355338, %v129_v35 }
  0xe4   :  { %v1693_v34 = vmul.f32 0.35355338, %v124_v31 }
  0xe5   :  { %1502 = vrot.lane.b32.xlu1 %v1691_v32, %s1587_s27  ;;  %1447 = vmatprep.subr.msk.bf16.mxu1 %vm1687_vm2, %v1445_v33 }
  0xe6   :  { %1450 = vmatpush3.bf16.xpose.msk.msra.mxu1 %vm1687_vm2, %v1445_v33  ;;  %1358 = vmatprep.mubr.msk.f32.mxu1 %vm294_vm1, %v1693_v34 }
  0xe8   :  { %v1353_v36 = vpop.f32.mrb[2].mxu0 }
  0xe9   :  { %488 = vrot.lane.b32.xlu1 %v1693_v34, %s1587_s27  ;;  %v285_v37 = vpop.f32.mrb[3].mxu0 }
  0xea   :  { %v1451_v38 = vpack.c.bf16 %v1353_v36, %v285_v37  ;;  %v1725_v54 = vpack.i.bf16 %v1353_v36, %v285_v37 }
  0xec   :  { %1452 = vmatprep.subr.bf16.mxu1 %v1451_v38 }
  0xed   :  { %1359 = vmatmul.mubr.msk.f32.vlgmr.msra.gmra.mrb[2].mxu1 %vm294_vm1, %v1705_v39  ;;  %1507 = vrot.lane.b32.xlu1 %v1725_v54, %s1587_s27 }
  0xee   :  { %1454 = vmatpush3.bf16.msra.mxu1 %v1451_v38 }
 0x157   :  { %v1503_v40 = vpop.permute.xlu1 %1502 }
 0x158   :  { %v1505_v41 = vunpack.i.h.bf16 %v1503_v40  ;;  %v1504_v42 = vunpack.i.l.bf16 %v1503_v40 }
 0x15a   :  { %v1455_v43 = vpack.c.bf16 %v1505_v41, %v1504_v42 }
 0x15b   :  { %v489_v55 = vpop.permute.xlu1 %488 }
 0x15c   :  { %1457 = vmatprep.subr.msk.bf16.mxu1 %vm1687_vm2, %v1455_v43 }
 0x15f   :  { %v1508_v56 = vpop.permute.xlu1 %1507 }
 0x160   :  { %v1510_v57 = vunpack.i.h.bf16 %v1508_v56  ;;  %v1509_v58 = vunpack.i.l.bf16 %v1508_v56 }
 0x162   :  { %v1461_v59 = vpack.c.bf16 %v1510_v57, %v1509_v58 }
 0x164   :  { %1462 = vmatprep.subr.bf16.mxu0 %v1461_v59 }
 0x165   :  { %1464 = vmatpush3.bf16.msra.mxu0 %v1461_v59 }
 0x1c0   :  { %v1360_v46 = vpop.f32.mrb[2].mxu1 }
 0x1c1   :  { %v373_v47 = vpop.f32.mrb[3].mxu1  ;;  %v379_v48 = vadd.f32 %v1360_v46, %v1714_v44 }
 0x1c2   :  { %v374_v49 = vadd.f32 %v373_v47, %v1719_v45 }
 0x1c3   :  { %v383_v51 = vmax.f32 %v379_v48, -3.4028235e+38 }
 0x1c4   :  { %v382_v50 = vmax.f32 %v374_v49, -3.4028235e+38 }
 0x1c5   :  { %v388_v53 = vsel %vm384_vm3, %v383_v51, -inf }
 0x1c6   :  { %v385_v52 = vsel %vm384_vm3, %v382_v50, -inf }
 0x1c7   :  { %386 = vmax.xlane.f32.xlu0 %v385_v52 }
 0x1cb   :  { %389 = vmax.xlane.f32.xlu0 %v388_v53 }
 0x1e1   :  { %490 = vrot.lane.b32.xlu0 %v1705_v39, %s1587_s27 }
 0x254   :  { %v387_v60 = vpop.xlane.xlu0 %386 }
 0x255   :  { %v391_v61 = vsub.f32 %v382_v50, %v387_v60 }
 0x257   :  { %v393_v62 = vmul.f32 1.442695, %v391_v61 }
 0x258   :  { %v390_v63 = vpop.xlane.xlu0 %389 }
 0x259   :  { %1531 = vpow2.f32 %v393_v62  ;;  %v392_v0 = vsub.f32 %v383_v51, %v390_v63 }
 0x25b   :  { %v395_v1 = vmul.f32 1.442695, %v392_v0 }
 0x25c   :  { %v491_v4 = vpop.permute.xlu0 %490 }
 0x25d   :  { %1533 = vpow2.f32 %v395_v1 }
 0x263   :  { %v1731_v2 = vpop.eup %1531 }
 0x264   :  { %1365 = vmatprep.mubr.msk.f32.mxu1 %vm384_vm3, %v1731_v2 }
 0x267   :  { %v1735_v3 = vpop.eup %1533 }
 0x268   :  { %1366 = vmatmul.mubr.msk.f32.vlgmr.msra.gmra.mrb[4].mxu1 %vm384_vm3, %v1735_v3 }
 0x269   :  { %1460 = vmatpush3.bf16.xpose.msk.msra.mxu1 %vm1687_vm2, %v1455_v43  ;;  %1372 = vmatprep.mubr.msk.f32.mxu1 %vm294_vm1, %v489_v55 }
 0x270   :  { %1373 = vmatmul.mubr.msk.f32.vlgmr.msra.gmra.mrb[6].mxu1 %vm294_vm1, %v491_v4 }
 0x33b   :  { %v1743_v5 = vpop.f32.mrb[4].mxu1 }
 0x33c   :  { %v1745_v6 = vpop.f32.mrb[5].mxu1 }
 0x343   :  { %v1374_v7 = vpop.f32.mrb[6].mxu1 }
 0x344   :  { %v576_v8 = vadd.f32 %v1374_v7, %v1714_v44  ;;  %v570_v9 = vpop.f32.mrb[7].mxu1 }
 0x345   :  { %v571_v10 = vadd.f32 %v570_v9, %v1719_v45 }
 0x346   :  { %v580_v11 = vmax.f32 %v576_v8, -3.4028235e+38 }
 0x347   :  { %v579_v12 = vmax.f32 %v571_v10, -3.4028235e+38 }
 0x348   :  { %v584_v13 = vsel %vm384_vm3, %v580_v11, -inf }
 0x349   :  { %585 = vmax.xlane.f32.xlu0 %v584_v13  ;;  %v581_v14 = vsel %vm384_vm3, %v579_v12, -inf }
 0x34a   :  { %582 = vmax.xlane.f32.xlu1 %v581_v14 }
 0x35b   :  { %692 = vrot.lane.b32.xlu1 %v1693_v34, %s1588_s2 }
 0x35f   :  { %1512 = vrot.lane.b32.xlu0 %v1691_v32, %s1588_s2  ;;  %694 = vrot.lane.b32.xlu1 %v1705_v39, %s1588_s2 }
 0x363   :  { %1517 = vrot.lane.b32.xlu1 %v1725_v54, %s1588_s2 }
 0x3d6   :  { %v586_v15 = vpop.xlane.xlu0 %585 }
 0x3d7   :  { %v588_v16 = vsub.f32 %v580_v11, %v586_v15  ;;  %v583_v17 = vpop.xlane.xlu1 %582 }
 0x3d8   :  { %v587_v18 = vsub.f32 %v579_v12, %v583_v17 }
 0x3d9   :  { %v591_v19 = vmul.f32 1.442695, %v588_v16 }
 0x3da   :  { %v589_v20 = vmul.f32 1.442695, %v587_v18  ;;  %v1513_v21 = vpop.permute.xlu0 %1512 }
 0x3db   :  { %v1515_v22 = vunpack.i.h.bf16 %v1513_v21  ;;  %v1514_v23 = vunpack.i.l.bf16 %v1513_v21  ;;  %v693_v24 = vpop.permute.xlu1 %692 }
 0x3dc   :  { %1535 = vpow2.f32 %v589_v20 }
 0x3dd   :  { %1537 = vpow2.f32 %v591_v19  ;;  %v1465_v25 = vpack.c.bf16 %v1515_v22, %v1514_v23 }
 0x3df   :  { %1467 = vmatprep.subr.msk.bf16.mxu0 %vm1687_vm2, %v1465_v25  ;;  %v695_v26 = vpop.permute.xlu1 %694 }
 0x3e3   :  { %v1518_v27 = vpop.permute.xlu1 %1517 }
 0x3e4   :  { %v1520_v28 = vunpack.i.h.bf16 %v1518_v27  ;;  %v1519_v29 = vunpack.i.l.bf16 %v1518_v27 }
 0x3e6   :  { %v1536_v31 = vpop.eup %1535  ;;  %v1471_v33 = vpack.c.bf16 %v1520_v28, %v1519_v29  ;;  %v397_v28 = vsel %vm384_vm3, %v1731_v2, 0.0  ;;  %v400_v29 = vsel %vm384_vm3, %v1735_v3, 0.0 }
 0x3e7   :  { %v1538_v35 = vpop.eup %1537  ;;  %1379 = vmatprep.mubr.msk.f32.mxu0 %vm384_vm3, %v1536_v31  ;;  %v593_v10 = vsel %vm384_vm3, %v1536_v31, 0.0 }
 0x3e8   :  { %1380 = vmatmul.mubr.msk.f32.vlgmr.msra.gmra.mrb[4].mxu0 %vm384_vm3, %v1538_v35  ;;  %1472 = vmatprep.subr.bf16.mxu1 %v1471_v33  ;;  %v596_v11 = vsel %vm384_vm3, %v1538_v35, 0.0 }
 0x3e9   :  { %1470 = vmatpush3.bf16.xpose.msk.msra.mxu0 %vm1687_vm2, %v1465_v25  ;;  %1386 = vmatprep.mubr.msk.f32.mxu0 %vm294_vm1, %v693_v24 }
 0x3ea   :  { %1474 = vmatpush3.bf16.msra.mxu1 %v1471_v33 }
 0x3f0   :  { %1387 = vmatmul.mubr.msk.f32.vlgmr.msra.gmra.mrb[6].mxu0 %vm294_vm1, %v695_v26 }
 0x4bb   :  { %v1763_v36 = vpop.f32.mrb[4].mxu0 }
 0x4bc   :  { %v1765_v37 = vpop.f32.mrb[5].mxu0 }
 0x4c3   :  { %v1388_v38 = vpop.f32.mrb[6].mxu0 }
 0x4c4   :  { %v780_v40 = vadd.f32 %v1388_v38, %v1714_v44  ;;  %v774_v41 = vpop.f32.mrb[7].mxu0 }
 0x4c5   :  { %v775_v42 = vadd.f32 %v774_v41, %v1719_v45 }
 0x4c6   :  { %v784_v43 = vmax.f32 %v780_v40, -3.4028235e+38 }
 0x4c7   :  { %v783_v46 = vmax.f32 %v775_v42, -3.4028235e+38 }
 0x4c8   :  { %v788_v47 = vsel %vm384_vm3, %v784_v43, -inf }
 0x4c9   :  { %789 = vmax.xlane.f32.xlu0 %v788_v47  ;;  %v785_v48 = vsel %vm384_vm3, %v783_v46, -inf }
 0x4ca   :  { %786 = vmax.xlane.f32.xlu1 %v785_v48  ;;  %v42_v48 = vld [vmem:[%s1851_s3 + $0x78] sm:$0xff] }
 0x4db   :  { %894 = vrot.lane.b32.xlu1 %v1693_v34, %s1589_s7 }
 0x4df   :  { %1522 = vrot.lane.b32.xlu0 %v1691_v32, %s1589_s7  ;;  %896 = vrot.lane.b32.xlu1 %v1705_v39, %s1589_s7 }
 0x556   :  { %v790_v49 = vpop.xlane.xlu0 %789 }
 0x557   :  { %v792_v50 = vsub.f32 %v784_v43, %v790_v49  ;;  %v787_v51 = vpop.xlane.xlu1 %786  ;;  %v39_v43 = vld [vmem:[%s1851_s3 + $0x60] sm:$0xff] }
 0x558   :  { %v791_v52 = vsub.f32 %v783_v46, %v787_v51 }
 0x559   :  { %v795_v53 = vmul.f32 1.442695, %v792_v50 }
 0x55a   :  { %v793_v55 = vmul.f32 1.442695, %v791_v52  ;;  %v1523_v56 = vpop.permute.xlu0 %1522 }
 0x55b   :  { %v1525_v57 = vunpack.i.h.bf16 %v1523_v56  ;;  %v1524_v58 = vunpack.i.l.bf16 %v1523_v56  ;;  %v895_v39 = vpop.permute.xlu1 %894 }
 0x55c   :  { %1539 = vpow2.f32 %v793_v55 }
 0x55d   :  { %1541 = vpow2.f32 %v795_v53  ;;  %v1475_v59 = vpack.c.bf16 %v1525_v57, %v1524_v58 }
 0x55f   :  { %1477 = vmatprep.subr.msk.bf16.mxu1 %vm1687_vm2, %v1475_v59  ;;  %v897_v60 = vpop.permute.xlu1 %896 }
 0x566   :  { %v1540_v34 = vpop.eup %1539 }
 0x567   :  { %v1542_v32 = vpop.eup %1541  ;;  %1393 = vmatprep.mubr.msk.f32.mxu1 %vm384_vm3, %v1540_v34  ;;  %v797_v12 = vsel %vm384_vm3, %v1540_v34, 0.0 }
 0x568   :  { %1394 = vmatmul.mubr.msk.f32.vlgmr.msra.gmra.mrb[8].mxu1 %vm384_vm3, %v1542_v32 }
 0x569   :  { %1480 = vmatpush3.bf16.xpose.msk.msra.mxu1 %vm1687_vm2, %v1475_v59  ;;  %1400 = vmatprep.mubr.msk.f32.mxu1 %vm294_vm1, %v895_v39 }
 0x570   :  { %1401 = vmatmul.mubr.msk.f32.vlgmr.msra.gmra.mrb[10].mxu1 %vm294_vm1, %v897_v60 }
 0x63b   :  { %v1785_v61 = vpop.f32.mrb[8].mxu1 }
 0x63c   :  { %v881_v62 = vpop.f32.mrb[9].mxu1 }
 0x643   :  { %v1402_v63 = vpop.f32.mrb[10].mxu1 }
 0x644   :  { %v982_v0 = vadd.f32 %v1402_v63, %v1714_v44  ;;  %v976_v1 = vpop.f32.mrb[11].mxu1  ;;  %v800_v44 = vsel %vm384_vm3, %v1542_v32, 0.0 }
 0x645   :  { %v977_v4 = vadd.f32 %v976_v1, %v1719_v45 }
 0x646   :  { %v986_v7 = vmax.f32 %v982_v0, -3.4028235e+38 }
 0x647   :  { %v985_v8 = vmax.f32 %v977_v4, -3.4028235e+38 }
 0x648   :  { %v990_v9 = vsel %vm384_vm3, %v986_v7, -inf }
 0x649   :  { %991 = vmax.xlane.f32.xlu0 %v990_v9  ;;  %v987_v30 = vsel %vm384_vm3, %v985_v8, -inf }
 0x64a   :  { %988 = vmax.xlane.f32.xlu1 %v987_v30 }
 0x64d   :  { %594 = vadd.xlane.f32.xlu0 %v593_v10 }
 0x651   :  { %597 = vadd.xlane.f32.xlu0 %v596_v11 }
 0x655   :  { %798 = vadd.xlane.f32.xlu0 %v797_v12 }
 0x659   :  { %801 = vadd.xlane.f32.xlu0 %v800_v44 }
 0x65b   :  { %1527 = vrot.lane.b32.xlu1 %v1725_v54, %s1589_s7 }
 0x6d6   :  { %v992_v45 = vpop.xlane.xlu0 %991 }
 0x6d7   :  { %v994_v13 = vsub.f32 %v986_v7, %v992_v45  ;;  %v989_v14 = vpop.xlane.xlu1 %988 }
 0x6d8   :  { %v993_v15 = vsub.f32 %v985_v8, %v989_v14 }
 0x6d9   :  { %v997_v16 = vmul.f32 1.442695, %v994_v13 }
 0x6da   :  { %v995_v17 = vmul.f32 1.442695, %v993_v15  ;;  %v595_v18 = vpop.xlane.xlu0 %594 }
 0x6db   :  { %1543 = vpow2.f32 %v997_v16  ;;  %v1528_v19 = vpop.permute.xlu1 %1527 }
 0x6dc   :  { %1545 = vpow2.f32 %v995_v17  ;;  %v1530_v20 = vunpack.i.h.bf16 %v1528_v19  ;;  %v1529_v21 = vunpack.i.l.bf16 %v1528_v19 }
 0x6de   :  { %v1481_v22 = vpack.c.bf16 %v1530_v20, %v1529_v21  ;;  %v598_v23 = vpop.xlane.xlu0 %597 }
 0x6e0   :  { %1482 = vmatprep.subr.bf16.mxu0 %v1481_v22 }
 0x6e1   :  { %1484 = vmatpush3.bf16.msra.mxu0 %v1481_v22 }
 0x6e2   :  { %v799_v26 = vpop.xlane.xlu0 %798 }
 0x6e3   :  { %1547 = vrcp.f32 %v799_v26 }
 0x6e4   :  { %1549 = vrcp.f32 %v595_v18 }
 0x6e5   :  { %v1544_v24 = vpop.eup %1543  ;;  %1551 = vrcp.f32 %v598_v23 }
 0x6e6   :  { %v1546_v25 = vpop.eup %1545  ;;  %v1002_v54 = vsel %vm384_vm3, %v1544_v24, 0.0  ;;  %v802_v35 = vpop.xlane.xlu0 %801 }
 0x6e7   :  { %1003 = vadd.xlane.f32.xlu1 %v1002_v54  ;;  %1407 = vmatprep.mubr.msk.f32.mxu0 %vm384_vm3, %v1546_v25  ;;  %v999_v27 = vsel %vm384_vm3, %v1546_v25, 0.0  ;;  %1553 = vrcp.f32 %v802_v35 }
 0x6e8   :  { %1000 = vadd.xlane.f32.xlu0 %v999_v27  ;;  %1408 = vmatmul.mubr.msk.f32.vlgmr.msra.gmra.mrb[8].mxu0 %vm384_vm3, %v1544_v24 }
 0x6ec   :  { %398 = vadd.xlane.f32.xlu0 %v397_v28 }
 0x6ed   :  { %v1548_v31 = vpop.eup %1547 }
 0x6ee   :  { %v892_v33 = vmul.f32 %v1548_v31, %v881_v62  ;;  %v1550_v38 = vpop.eup %1549 }
 0x6ef   :  { %v690_v40 = vmul.f32 %v1550_v38, %v1765_v37  ;;  %v1552_v41 = vpop.eup %1551  ;;  %v40_v37 = vld [vmem:[%s1851_s3 + $0x68] sm:$0xff] }
 0x6f0   :  { %401 = vadd.xlane.f32.xlu0 %v400_v29  ;;  %v691_v2 = vmul.f32 %v1552_v41, %v1763_v36  ;;  %v1485_v46 = vpack.c.bf16 %v40_v37, %v39_v43  ;;  %v41_v36 = vld [vmem:[%s1851_s3 + $0x70] sm:$0xff] }
 0x6f1   :  { %v1554_v42 = vpop.eup %1553  ;;  %v1489_v50 = vpack.c.bf16 %v42_v48, %v41_v36 }
 0x6f2   :  { %v893_v3 = vmul.f32 %v1554_v42, %v1785_v61  ;;  %1486 = vmatprep.subr.bf16.mxu0 %v1485_v46 }
 0x6f3   :  { %1488 = vmatpush3.bf16.msra.mxu0 %v1485_v46 }
 0x6f4   :  { %1490 = vmatprep.subr.bf16.mxu0 %v1489_v50 }
 0x6f7   :  { %1492 = vmatpush3.bf16.msra.mxu0 %v1489_v50 }
 0x6f8   :  { %1106 = vrot.lane.b32.xlu1 %v892_v33, %s1590_s8 }
 0x706   :  { %1098 = vrot.lane.b32.xlu0 %v690_v40, %s1591_s9 }
 0x70a   :  { %1100 = vrot.lane.b32.xlu0 %v691_v2, %s1591_s9 }
 0x70e   :  { %1108 = vrot.lane.b32.xlu0 %v893_v3, %s1590_s8 }
 0x774   :  { %v1004_v49 = vpop.xlane.xlu1 %1003 }
 0x775   :  { %v1001_v47 = vpop.xlane.xlu0 %1000 }
 0x776   :  { %1555 = vrcp.f32 %v1001_v47 }
 0x777   :  { %1557 = vrcp.f32 %v1004_v49 }
 0x778   :  { %v1107_v1 = vpop.permute.xlu1 %1106 }
 0x779   :  { %v399_v58 = vpop.xlane.xlu0 %398 }
 0x77a   :  { %1559 = vrcp.f32 %v399_v58 }
 0x77d   :  { %v402_v59 = vpop.xlane.xlu0 %401 }
 0x77e   :  { %1561 = vrcp.f32 %v402_v59 }
 0x780   :  { %v1556_v52 = vpop.eup %1555 }
 0x781   :  { %v1558_v56 = vpop.eup %1557  ;;  %v1099_v34 = vpop.permute.xlu0 %1098 }
 0x784   :  { %v1560_v32 = vpop.eup %1559 }
 0x785   :  { %v1101_v39 = vpop.permute.xlu0 %1100  ;;  %v486_v60 = vmul.f32 %v1560_v32, %v1745_v6 }
 0x787   :  { %v1120_v63 = vsel %vm294_vm1, %v486_v60, %v1099_v34 }
 0x788   :  { %v1562_v61 = vpop.eup %1561  ;;  %v1122_v4 = vsel %vm384_vm3, %v1120_v63, %v1107_v1 }
 0x789   :  { %v1109_v62 = vpop.permute.xlu0 %1108  ;;  %v487_v0 = vmul.f32 %v1562_v61, %v1743_v5  ;;  %v1262_v5 = vld [vmem:[%s1852_s4 + $0x2] ss:$0 sm:$0xff] }
 0x78b   :  { %v1121_v8 = vsel %vm294_vm1, %v487_v0, %v1101_v39 }
 0x78c   :  { %v1123_v30 = vsel %vm384_vm3, %v1121_v8, %v1109_v62 }
 0x7bb   :  { %v1409_v51 = vpop.f32.mrb[8].mxu0 }
 0x7bc   :  { %v1083_v53 = vpop.f32.mrb[9].mxu0  ;;  %v1095_v57 = vmul.f32 %v1558_v56, %v1409_v51 }
 0x7bd   :  { %v1094_v55 = vmul.f32 %v1556_v52, %v1083_v53 }
 0x7bf   :  { %1114 = vrot.lane.b32.xlu0 %v1094_v55, %s1592_s18 }
 0x7c3   :  { %1116 = vrot.lane.b32.xlu0 %v1095_v57, %s1592_s18 }
 0x831   :  { %v1115_v7 = vpop.permute.xlu0 %1114 }
 0x832   :  { %v1125_v9 = vsel %vm1124_vm4, %v1122_v4, %v1115_v7 }
 0x833   :  { %1418 = vmatprep.mubr.msk.f32.mxu0 %vm50_vm0, %v1125_v9 }
 0x835   :  { %v1117_v10 = vpop.permute.xlu0 %1116 }
 0x836   :  { %v1126_v6 = vsel %vm1124_vm4, %v1123_v30, %v1117_v10 }
 0x837   :  { %1419 = vmatmul.mubr.msk.f32.vlgmr.msra.gmra.mrb[10].mxu0 %vm50_vm0, %v1126_v6 }
 0x90a   :  { %v1420_v11 = vpop.f32.mrb[10].mxu0 }
 0x90b   :  { %v1209_v12 = vadd.f32 %v1420_v11, %v1262_v5  ;;  %v1203_v44 = vpop.f32.mrb[11].mxu0 }
 0x90c   :  { %v1204_v45 = vadd.f32 %v1262_v5, %v1203_v44 }
 0x90d   :  { %1213 = vst.msk [vmem:[#allocation2 + $0x8] sm:$0xff] %vm50_vm0, %v1209_v12 }
 0x90e   :  { %1212 = vst.msk [vmem:[#allocation2] sm:$0xff] %vm50_vm0, %v1204_v45 }
 0x90f   :  { %1574 = shalt.err (!%p1571_p4)
}
 0x910   :  { %s1575_s24 = scalar_lea.hbm %s1853_s5, 256 }
 0x911   :  { %p1576_p5 = scmp.ne.s32.totalorder %s1853_s5, %s1575_s24  ;;  %p1579_p6 = scmp.lt.u32.totalorder %s1575_s24, %s1853_s5 }
 0x913   :  { %p1581_p7 = pnand %p1579_p6, %p1576_p5 }
 0x915   :  { %1584 = shalt.err (!%p1581_p7)
}
 0x916   :  { %s1594_s27 = smov 128  }
 0x917   :  { %1225 = dma.vmem_to_hbm [thread:$0]  %s1220_s21, 256, %s1853_s5, [#allocation3], %s1594_s27, %s1594_s27, %s1591_s9  }
 0x918   :  { %1585 = dma.done.wait [#allocation3], 256  }
 0x919   :  { %1586 = vsyncadd [#allocation3], 4294967040 }
 0x91a   :  { %1229 = vsyncpa [#allocation3], 1 }

</bundles_post_ra>
